<compile_context>
chip_gen: v7x
topology: tpu7x:2x2x1
jax: 0.10.0
libtpu: 0.0.40
codegen_flags: <defaults>
</compile_context>

<pallas_src>
import jax
import jax.numpy as jnp
import numpy as np
from jax import lax
from jax.experimental import pallas as pl
from jax.experimental.pallas import tpu as pltpu


# --------------------------------------------------------------------------
# Pallas kernel
# --------------------------------------------------------------------------
def _decoder_kernel(
    tok_ref,      # (B,)  int32, SMEM (scalar prefetch)
    h_ref,        # (B, Hp)       previous hidden state (zero-padded)
    code_ref,     # (B, Tc, Hp)   code encoder output  (zero-padded)
    sbt_ref,      # (B, Ts, Hp)   sbt  encoder output  (zero-padded)
    emb_ref,      # (V, E)        embedding table
    wih_ref,      # (E, 3Hp)      GRU input weights^T, gate order (r,z,n)
    whh_ref,      # (Hp, 3Hp)     GRU hidden weights^T
    gbias_ref,    # (2, 3Hp)      row0 = b_ih, row1 = b_hh
    w1_ref,       # (3Hp, Hp)     predict[0]^T, rows = [txt_ctx | h | ast_ctx]
    w2_ref,       # (Hp, Vp)      predict[2]^T
    pbias_ref,    # (1, Hp+Vp)    [b1 | b2]
    out_ref,      # (B, Vp)       padded logits
    hid_ref,      # (B, Hp)       padded new hidden state
    x_ref,        # VMEM scratch (B, E) f32: gathered embeddings
):
    f32 = jnp.float32
    B, Hp = h_ref.shape
    V = emb_ref.shape[0]

    # ---- embedding row gather (token ids scalar-prefetched into SMEM) ----
    for b in range(B):                               # B is static & tiny
        tok_b = jnp.clip(tok_ref[b], 0, V - 1)       # clamp like lax gather
        x_ref[pl.ds(b, 1), :] = emb_ref[pl.ds(tok_b, 1), :].astype(f32)
    x = x_ref[...]                                   # (B, E)

    # ---- GRUCell: two merged MXU passes, lane-aligned gate slices --------
    h_prev = h_ref[...].astype(f32)
    gi = jnp.dot(x, wih_ref[...], preferred_element_type=f32) + gbias_ref[0:1, :]
    gh = jnp.dot(h_prev, whh_ref[...], preferred_element_type=f32) + gbias_ref[1:2, :]
    r = jax.nn.sigmoid(gi[:, :Hp] + gh[:, :Hp])
    z = jax.nn.sigmoid(gi[:, Hp:2 * Hp] + gh[:, Hp:2 * Hp])
    n = jnp.tanh(gi[:, 2 * Hp:] + r * gh[:, 2 * Hp:])
    h_new = (1.0 - z) * n + z * h_prev               # (B, Hp); pads stay 0
    hid_ref[...] = h_new.astype(hid_ref.dtype)       # lane-dense store

    # ---- attention: scores on VPU/XLU, context on MXU, exact softmax -----
    def attend(enc):                                 # enc: (B, T, Hp) f32
        s = jnp.sum(enc * h_new[:, None, :], axis=-1)          # (B, T)
        s = s - jnp.max(s, axis=-1, keepdims=True)
        p = jnp.exp(s)                                          # unnormalized
        ctx = jnp.einsum('bqt,bth->bqh', p[:, None, :], enc,
                         preferred_element_type=f32)[:, 0, :]   # (B, Hp)
        return ctx / jnp.sum(p, axis=-1, keepdims=True)         # exact softmax

    txt_ctx = attend(code_ref[...].astype(f32))
    ast_ctx = attend(sbt_ref[...].astype(f32))

    # ---- prediction MLP: single (3Hp,Hp) matmul on aligned lane concat ---
    ctx = jnp.concatenate([txt_ctx, h_new, ast_ctx], axis=-1)   # (B, 3Hp)
    hmid = jnp.dot(ctx, w1_ref[...], preferred_element_type=f32) + pbias_ref[:, :Hp]
    hmid = jnp.maximum(hmid, 0.0)
    logits = jnp.dot(hmid, w2_ref[...], preferred_element_type=f32) + pbias_ref[:, Hp:]
    out_ref[...] = logits.astype(out_ref.dtype)                 # (B, Vp) lane-dense


# --------------------------------------------------------------------------
# Wrapper
# --------------------------------------------------------------------------
def _round_up(n, m):
    return ((n + m - 1) // m) * m


def _full_spec(shape):
    # whole-array block; index_map also receives the scalar-prefetch ref
    return pl.BlockSpec(shape, lambda *_: (0,) * len(shape))


def _pad_last(x, new):
    return jnp.pad(x, [(0, 0)] * (x.ndim - 1) + [(0, new - x.shape[-1])])


def _pad_gate_blocks(w, h, hp):
    """(..., 3h) gate-blocked (r,z,n) -> (..., 3hp), zero padding each block."""
    blocks = [_pad_last(w[..., i * h:(i + 1) * h], hp) for i in range(3)]
    return jnp.concatenate(blocks, axis=-1)


@jax.jit
def code_attn_gru_decoder(method_summary_token, sbt_encoder_output,
                          code_encoder_output, prev_hidden_states, params):
    emb = params["embedding"]                         # (V, E)
    V, E = emb.shape
    H = prev_hidden_states.shape[-1]
    B = method_summary_token.shape[0]
    Hp = _round_up(H, 128)
    Vp = _round_up(V, 128)   # TODO(synk): 256 granule on v6e/v7x at real vocab

    # NOTE: the padding/packing below is parameter preprocessing; in a real
    # decoder it is done once, not per call.

    # --- GRU weights kept merged (2 MXU passes); pad each gate block to Hp ---
    wih_p = _pad_gate_blocks(params["w_ih_t"], H, Hp)                # (E, 3Hp)
    whh_p = jnp.pad(_pad_gate_blocks(params["w_hh_t"], H, Hp),
                    ((0, Hp - H), (0, 0)))                           # (Hp, 3Hp)
    gbias = jnp.concatenate(
        [_pad_gate_blocks(params["b_ih"], H, Hp),
         _pad_gate_blocks(params["b_hh"], H, Hp)], axis=0)           # (2, 3Hp)

    # --- predict MLP: pad w1 per ctx chunk [txt | h | ast]; pack biases ---
    w1_t = params["w1_t"]                                            # (3H, H)
    w1_p = jnp.concatenate(
        [jnp.pad(w1_t[i * H:(i + 1) * H], ((0, Hp - H), (0, Hp - H)))
         for i in range(3)], axis=0)                                 # (3Hp, Hp)
    w2_p = jnp.pad(params["w2_t"], ((0, Hp - H), (0, Vp - V)))       # (Hp, Vp)
    pbias = jnp.concatenate(
        [_pad_last(params["b1"], Hp), _pad_last(params["b2"], Vp)], axis=1)

    # --- activations: zero-pad hidden axis to Hp (exact; pads stay zero) ---
    h_p = _pad_last(prev_hidden_states, Hp)                          # (B, Hp)
    code_p = _pad_last(code_encoder_output, Hp)                      # (B, Tc, Hp)
    sbt_p = _pad_last(sbt_encoder_output, Hp)                        # (B, Ts, Hp)
    tok = method_summary_token.astype(jnp.int32).reshape(B)

    tensor_args = (h_p, code_p, sbt_p, emb, wih_p, whh_p, gbias,
                   w1_p, w2_p, pbias)

    grid_spec = pltpu.PrefetchScalarGridSpec(
        num_scalar_prefetch=1,                       # token ids -> SMEM
        grid=(1,),
        in_specs=[_full_spec(a.shape) for a in tensor_args],
        out_specs=(_full_spec((B, Vp)), _full_spec((B, Hp))),
        scratch_shapes=[pltpu.VMEM((B, E), jnp.float32)],
    )

    logits_p, hidden_p = pl.pallas_call(
        _decoder_kernel,
        grid_spec=grid_spec,
        out_shape=(jax.ShapeDtypeStruct((B, Vp), jnp.float32),
                   jax.ShapeDtypeStruct((B, Hp), jnp.float32)),
        compiler_params=pltpu.CompilerParams(
            dimension_semantics=("arbitrary",)),
    )(tok, *tensor_args)

    return logits_p[:, :V], hidden_p[:, :H]


# --------------------------------------------------------------------------
# Pure-JAX reference (PyTorch semantics, for correctness check)
# --------------------------------------------------------------------------
def reference(method_summary_token, sbt_encoder_output, code_encoder_output,
              prev_hidden_states, params):
    x = params["embedding"][method_summary_token]
    H = prev_hidden_states.shape[-1]
    gi = x @ params["w_ih_t"] + params["b_ih"]
    gh = prev_hidden_states @ params["w_hh_t"] + params["b_hh"]
    r = jax.nn.sigmoid(gi[:, :H] + gh[:, :H])
    z = jax.nn.sigmoid(gi[:, H:2 * H] + gh[:, H:2 * H])
    n = jnp.tanh(gi[:, 2 * H:] + r * gh[:, 2 * H:])
    h = (1.0 - z) * n + z * prev_hidden_states

    def attend(enc):
        s = jnp.einsum("bh,bth->bt", h, enc)
        p = jax.nn.softmax(s, axis=-1)
        return jnp.einsum("bt,bth->bh", p, enc)

    txt_ctx = attend(code_encoder_output)
    ast_ctx = attend(sbt_encoder_output)
    ctx = jnp.concatenate([txt_ctx, h, ast_ctx], axis=-1)
    hmid = jnp.maximum(ctx @ params["w1_t"] + params["b1"], 0.0)
    out = hmid @ params["w2_t"] + params["b2"]
    return out, h


# --------------------------------------------------------------------------
# Main
# --------------------------------------------------------------------------
if __name__ == "__main__":
    # Small shapes implied by the module's forward.
    VOCAB = 64     # vocab_size
    E = 16         # emd_dim
    H = 32         # hidden_size
    B = 2          # batch
    TC = 12        # code encoder sequence length
    TS = 10        # sbt encoder sequence length

    key = jax.random.PRNGKey(0)
    ks = jax.random.split(key, 12)

    scale = 1.0 / np.sqrt(H)
    params = {
        "embedding": jax.random.normal(ks[0], (VOCAB, E), jnp.float32) * 0.1,
        # GRUCell weights, stored pre-transposed; gate order (r, z, n)
        "w_ih_t": jax.random.uniform(ks[1], (E, 3 * H), jnp.float32, -scale, scale),
        "w_hh_t": jax.random.uniform(ks[2], (H, 3 * H), jnp.float32, -scale, scale),
        "b_ih":   jax.random.uniform(ks[3], (1, 3 * H), jnp.float32, -scale, scale),
        "b_hh":   jax.random.uniform(ks[4], (1, 3 * H), jnp.float32, -scale, scale),
        # predict = Linear(3H->H), ReLU, Linear(H->V), pre-transposed
        "w1_t": jax.random.uniform(ks[5], (3 * H, H), jnp.float32, -scale, scale),
        "b1":   jax.random.uniform(ks[6], (1, H), jnp.float32, -scale, scale),
        "w2_t": jax.random.uniform(ks[7], (H, VOCAB), jnp.float32, -scale, scale),
        "b2":   jax.random.uniform(ks[8], (1, VOCAB), jnp.float32, -scale, scale),
    }

    method_summary_token = jax.random.randint(ks[9], (B,), 0, VOCAB, jnp.int32)
    code_encoder_output = jax.random.normal(ks[10], (B, TC, H), jnp.float32)
    sbt_encoder_output = jax.random.normal(ks[11], (B, TS, H), jnp.float32)
    prev_hidden_states = jax.random.normal(key, (B, H), jnp.float32)
    # sbt_encoder_hidden / code_encoder_hidden are unused in the torch forward.

    out, hid = code_attn_gru_decoder(
        method_summary_token, sbt_encoder_output, code_encoder_output,
        prev_hidden_states, params)
    out, hid = jax.block_until_ready((out, hid))

    ref_out, ref_hid = reference(
        method_summary_token, sbt_encoder_output, code_encoder_output,
        prev_hidden_states, params)

    assert out.shape == (B, VOCAB) and hid.shape == (B, H)
    np.testing.assert_allclose(np.asarray(hid), np.asarray(ref_hid),
                               atol=1e-4, rtol=1e-4)
    # softmax normalization is exact now -> tight logits tolerance
    np.testing.assert_allclose(np.asarray(out), np.asarray(ref_out),
                               atol=1e-3, rtol=1e-3)

    print("KERNEL_OK")
</pallas_src>

<mosaic_0001>
module attributes {stable_mosaic.version = 11 : i64} {
  func.func @_decoder_kernel(%arg0: i32, %arg1: memref<2xi32, #tpu.memory_space<smem>>, %arg2: memref<2x128xf32, #tpu.memory_space<vmem>>, %arg3: memref<2x12x128xf32, #tpu.memory_space<vmem>>, %arg4: memref<2x10x128xf32, #tpu.memory_space<vmem>>, %arg5: memref<64x16xf32, #tpu.memory_space<vmem>>, %arg6: memref<16x384xf32, #tpu.memory_space<vmem>>, %arg7: memref<128x384xf32, #tpu.memory_space<vmem>>, %arg8: memref<2x384xf32, #tpu.memory_space<vmem>>, %arg9: memref<384x128xf32, #tpu.memory_space<vmem>>, %arg10: memref<128x128xf32, #tpu.memory_space<vmem>>, %arg11: memref<1x256xf32, #tpu.memory_space<vmem>>, %arg12: memref<2x128xf32, #tpu.memory_space<vmem>>, %arg13: memref<2x128xf32, #tpu.memory_space<vmem>>, %arg14: memref<2x16xf32, #tpu.memory_space<vmem>>) attributes {dimension_semantics = [#tpu.dimension_semantics<arbitrary>], iteration_bounds = array<i64: 1>, scalar_prefetch = 1 : i64, scratch_operands = 1 : i64, tpu.core_type = #tpu.core_type<tc>, window_params = [{pipeline_mode = #tpu.pipeline_mode<synchronous>, transform_indices = @transform_0, window_bounds = array<i64: 2, 128>}, {pipeline_mode = #tpu.pipeline_mode<synchronous>, transform_indices = @transform_1, window_bounds = array<i64: 2, 12, 128>}, {pipeline_mode = #tpu.pipeline_mode<synchronous>, transform_indices = @transform_2, window_bounds = array<i64: 2, 10, 128>}, {pipeline_mode = #tpu.pipeline_mode<synchronous>, transform_indices = @transform_3, window_bounds = array<i64: 64, 16>}, {pipeline_mode = #tpu.pipeline_mode<synchronous>, transform_indices = @transform_4, window_bounds = array<i64: 16, 384>}, {pipeline_mode = #tpu.pipeline_mode<synchronous>, transform_indices = @transform_5, window_bounds = array<i64: 128, 384>}, {pipeline_mode = #tpu.pipeline_mode<synchronous>, transform_indices = @transform_6, window_bounds = array<i64: 2, 384>}, {pipeline_mode = #tpu.pipeline_mode<synchronous>, transform_indices = @transform_7, window_bounds = array<i64: 384, 128>}, {pipeline_mode = #tpu.pipeline_mode<synchronous>, transform_indices = @transform_8, window_bounds = array<i64: 128, 128>}, {pipeline_mode = #tpu.pipeline_mode<synchronous>, transform_indices = @transform_9, window_bounds = array<i64: 1, 256>}, {pipeline_mode = #tpu.pipeline_mode<synchronous>, transform_indices = @transform_10, window_bounds = array<i64: 2, 128>}, {pipeline_mode = #tpu.pipeline_mode<synchronous>, transform_indices = @transform_11, window_bounds = array<i64: 2, 128>}]} {
    %c0 = arith.constant 0 : index
    %0 = memref.load %arg1[%c0] : memref<2xi32, #tpu.memory_space<smem>>
    %c0_i32 = arith.constant 0 : i32
    %c63_i32 = arith.constant 63 : i32
    %1 = arith.maxsi %c0_i32, %0 : i32
    %2 = arith.minsi %c63_i32, %1 : i32
    %3 = arith.index_cast %2 : i32 to index
    %c0_0 = arith.constant 0 : index
    %4 = vector.load %arg5[%3, %c0_0] : memref<64x16xf32, #tpu.memory_space<vmem>>, vector<1x16xf32>
    %c0_1 = arith.constant 0 : index
    %c0_2 = arith.constant 0 : index
    %5 = vector.load %arg14[%c0_1, %c0_2] : memref<2x16xf32, #tpu.memory_space<vmem>>, vector<1x16xf32>
    tpu.vector_store %arg14[%c0_1, %c0_2], %4 {strides = array<i32>} : memref<2x16xf32, #tpu.memory_space<vmem>>, vector<1x16xf32>,
    %c1 = arith.constant 1 : index
    %6 = memref.load %arg1[%c1] : memref<2xi32, #tpu.memory_space<smem>>
    %c0_i32_3 = arith.constant 0 : i32
    %c63_i32_4 = arith.constant 63 : i32
    %7 = arith.maxsi %c0_i32_3, %6 : i32
    %8 = arith.minsi %c63_i32_4, %7 : i32
    %9 = arith.index_cast %8 : i32 to index
    %c0_5 = arith.constant 0 : index
    %10 = vector.load %arg5[%9, %c0_5] : memref<64x16xf32, #tpu.memory_space<vmem>>, vector<1x16xf32>
    %c1_6 = arith.constant 1 : index
    %c0_7 = arith.constant 0 : index
    %11 = vector.load %arg14[%c1_6, %c0_7] : memref<2x16xf32, #tpu.memory_space<vmem>>, vector<1x16xf32>
    tpu.vector_store %arg14[%c1_6, %c0_7], %10 {strides = array<i32>} : memref<2x16xf32, #tpu.memory_space<vmem>>, vector<1x16xf32>,
    %c0_8 = arith.constant 0 : index
    %c0_9 = arith.constant 0 : index
    %12 = vector.load %arg14[%c0_8, %c0_9] : memref<2x16xf32, #tpu.memory_space<vmem>>, vector<2x16xf32>
    %c0_10 = arith.constant 0 : index
    %c0_11 = arith.constant 0 : index
    %13 = vector.load %arg2[%c0_10, %c0_11] : memref<2x128xf32, #tpu.memory_space<vmem>>, vector<2x128xf32>
    %c0_12 = arith.constant 0 : index
    %c0_13 = arith.constant 0 : index
    %14 = vector.load %arg6[%c0_12, %c0_13] : memref<16x384xf32, #tpu.memory_space<vmem>>, vector<16x384xf32>
    %cst = arith.constant dense<0.000000e+00> : vector<2x384xf32>
    %15 = tpu.matmul %12, %14, %cst {dimension_numbers = #tpu.dot_dimension_numbers<[1], [0], [0], [1], [0, 0, 1, 1], [], []>} : vector<2x16xf32>, vector<16x384xf32>, vector<2x384xf32> -> vector<2x384xf32>
    %c0_14 = arith.constant 0 : index
    %c0_15 = arith.constant 0 : index
    %16 = vector.load %arg8[%c0_14, %c0_15] : memref<2x384xf32, #tpu.memory_space<vmem>>, vector<1x384xf32>
    %17 = vector.broadcast %16 : vector<1x384xf32> to vector<2x384xf32>
    %18 = arith.addf %15, %17 : vector<2x384xf32>
    %c0_16 = arith.constant 0 : index
    %c0_17 = arith.constant 0 : index
    %19 = vector.load %arg7[%c0_16, %c0_17] : memref<128x384xf32, #tpu.memory_space<vmem>>, vector<128x384xf32>
    %cst_18 = arith.constant dense<0.000000e+00> : vector<2x384xf32>
    %20 = tpu.matmul %13, %19, %cst_18 {dimension_numbers = #tpu.dot_dimension_numbers<[1], [0], [0], [1], [0, 0, 1, 1], [], []>} : vector<2x128xf32>, vector<128x384xf32>, vector<2x384xf32> -> vector<2x384xf32>
    %c1_19 = arith.constant 1 : index
    %c0_20 = arith.constant 0 : index
    %21 = vector.load %arg8[%c1_19, %c0_20] : memref<2x384xf32, #tpu.memory_space<vmem>>, vector<1x384xf32>
    %22 = vector.broadcast %21 : vector<1x384xf32> to vector<2x384xf32>
    %23 = arith.addf %20, %22 : vector<2x384xf32>
    %24 = vector.extract_strided_slice %18 {offsets = [0, 0], sizes = [2, 128], strides = [1, 1]} : vector<2x384xf32> to vector<2x128xf32>
    %25 = vector.extract_strided_slice %23 {offsets = [0, 0], sizes = [2, 128], strides = [1, 1]} : vector<2x384xf32> to vector<2x128xf32>
    %26 = arith.addf %24, %25 : vector<2x128xf32>
    %27 = arith.negf %26 : vector<2x128xf32>
    %28 = math.exp %27 : vector<2x128xf32>
    %cst_21 = arith.constant 1.000000e+00 : f32
    %29 = vector.broadcast %cst_21 : f32 to vector<2x128xf32>
    %30 = arith.addf %29, %28 : vector<2x128xf32>
    %31 = arith.divf %29, %30 : vector<2x128xf32>
    %32 = vector.extract_strided_slice %18 {offsets = [0, 128], sizes = [2, 128], strides = [1, 1]} : vector<2x384xf32> to vector<2x128xf32>
    %33 = vector.extract_strided_slice %23 {offsets = [0, 128], sizes = [2, 128], strides = [1, 1]} : vector<2x384xf32> to vector<2x128xf32>
    %34 = arith.addf %32, %33 : vector<2x128xf32>
    %35 = arith.negf %34 : vector<2x128xf32>
    %36 = math.exp %35 : vector<2x128xf32>
    %cst_22 = arith.constant 1.000000e+00 : f32
    %37 = vector.broadcast %cst_22 : f32 to vector<2x128xf32>
    %38 = arith.addf %37, %36 : vector<2x128xf32>
    %39 = arith.divf %37, %38 : vector<2x128xf32>
    %40 = vector.extract_strided_slice %18 {offsets = [0, 256], sizes = [2, 128], strides = [1, 1]} : vector<2x384xf32> to vector<2x128xf32>
    %41 = vector.extract_strided_slice %23 {offsets = [0, 256], sizes = [2, 128], strides = [1, 1]} : vector<2x384xf32> to vector<2x128xf32>
    %42 = arith.mulf %31, %41 : vector<2x128xf32>
    %43 = arith.addf %40, %42 : vector<2x128xf32>
    %44 = math.tanh %43 : vector<2x128xf32>
    %cst_23 = arith.constant 1.000000e+00 : f32
    %45 = vector.broadcast %cst_23 : f32 to vector<2x128xf32>
    %46 = arith.subf %45, %39 : vector<2x128xf32>
    %47 = arith.mulf %46, %44 : vector<2x128xf32>
    %48 = arith.mulf %39, %13 : vector<2x128xf32>
    %49 = arith.addf %47, %48 : vector<2x128xf32>
    %c0_24 = arith.constant 0 : index
    %c0_25 = arith.constant 0 : index
    %50 = vector.load %arg13[%c0_24, %c0_25] : memref<2x128xf32, #tpu.memory_space<vmem>>, vector<2x128xf32>
    tpu.vector_store %arg13[%c0_24, %c0_25], %49 {strides = array<i32>} : memref<2x128xf32, #tpu.memory_space<vmem>>, vector<2x128xf32>,
    %c0_26 = arith.constant 0 : index
    %c0_27 = arith.constant 0 : index
    %c0_28 = arith.constant 0 : index
    %51 = vector.load %arg3[%c0_26, %c0_27, %c0_28] : memref<2x12x128xf32, #tpu.memory_space<vmem>>, vector<2x12x128xf32>
    %52 = vector.shape_cast %49 : vector<2x128xf32> to vector<2x1x128xf32>
    %53 = vector.broadcast %52 : vector<2x1x128xf32> to vector<2x12x128xf32>
    %54 = arith.mulf %51, %53 : vector<2x12x128xf32>
    %cst_29 = arith.constant dense<0.000000e+00> : vector<2x12xf32>
    %55 = vector.multi_reduction <add>, %54, %cst_29 [2] : vector<2x12x128xf32> to vector<2x12xf32>
    %cst_30 = arith.constant dense<0xFF800000> : vector<2xf32>
    %56 = vector.multi_reduction <maximumf>, %55, %cst_30 [1] : vector<2x12xf32> to vector<2xf32>
    %57 = vector.shape_cast %56 : vector<2xf32> to vector<2x1xf32>
    %58 = vector.broadcast %57 : vector<2x1xf32> to vector<2x12xf32>
    %59 = arith.subf %55, %58 : vector<2x12xf32>
    %60 = math.exp %59 : vector<2x12xf32>
    %61 = vector.shape_cast %60 : vector<2x12xf32> to vector<2x1x12xf32>
    "tpu.trace_start"() <{level = 10 : i32, message = "bqt,bth->bqh"}> : () -> ()
    %cst_31 = arith.constant dense<0.000000e+00> : vector<2x1x128xf32>
    %62 = tpu.matmul %61, %51, %cst_31 {dimension_numbers = #tpu.dot_dimension_numbers<[2], [1], [1], [2], [0, 0, 0, 1, 1, 2], [0], [0]>} : vector<2x1x12xf32>, vector<2x12x128xf32>, vector<2x1x128xf32> -> vector<2x1x128xf32>
    "tpu.trace_stop"() : () -> ()
    %63 = vector.shape_cast %62 : vector<2x1x128xf32> to vector<2x128xf32>
    %cst_32 = arith.constant dense<0.000000e+00> : vector<2xf32>
    %64 = vector.multi_reduction <add>, %60, %cst_32 [1] : vector<2x12xf32> to vector<2xf32>
    %65 = vector.shape_cast %64 : vector<2xf32> to vector<2x1xf32>
    %66 = vector.broadcast %65 : vector<2x1xf32> to vector<2x128xf32>
    %67 = arith.divf %63, %66 : vector<2x128xf32>
    %c0_33 = arith.constant 0 : index
    %c0_34 = arith.constant 0 : index
    %c0_35 = arith.constant 0 : index
    %68 = vector.load %arg4[%c0_33, %c0_34, %c0_35] : memref<2x10x128xf32, #tpu.memory_space<vmem>>, vector<2x10x128xf32>
    %69 = vector.shape_cast %49 : vector<2x128xf32> to vector<2x1x128xf32>
    %70 = vector.broadcast %69 : vector<2x1x128xf32> to vector<2x10x128xf32>
    %71 = arith.mulf %68, %70 : vector<2x10x128xf32>
    %cst_36 = arith.constant dense<0.000000e+00> : vector<2x10xf32>
    %72 = vector.multi_reduction <add>, %71, %cst_36 [2] : vector<2x10x128xf32> to vector<2x10xf32>
    %cst_37 = arith.constant dense<0xFF800000> : vector<2xf32>
    %73 = vector.multi_reduction <maximumf>, %72, %cst_37 [1] : vector<2x10xf32> to vector<2xf32>
    %74 = vector.shape_cast %73 : vector<2xf32> to vector<2x1xf32>
    %75 = vector.broadcast %74 : vector<2x1xf32> to vector<2x10xf32>
    %76 = arith.subf %72, %75 : vector<2x10xf32>
    %77 = math.exp %76 : vector<2x10xf32>
    %78 = vector.shape_cast %77 : vector<2x10xf32> to vector<2x1x10xf32>
    "tpu.trace_start"() <{level = 10 : i32, message = "bqt,bth->bqh"}> : () -> ()
    %cst_38 = arith.constant dense<0.000000e+00> : vector<2x1x128xf32>
    %79 = tpu.matmul %78, %68, %cst_38 {dimension_numbers = #tpu.dot_dimension_numbers<[2], [1], [1], [2], [0, 0, 0, 1, 1, 2], [0], [0]>} : vector<2x1x10xf32>, vector<2x10x128xf32>, vector<2x1x128xf32> -> vector<2x1x128xf32>
    "tpu.trace_stop"() : () -> ()
    %80 = vector.shape_cast %79 : vector<2x1x128xf32> to vector<2x128xf32>
    %cst_39 = arith.constant dense<0.000000e+00> : vector<2xf32>
    %81 = vector.multi_reduction <add>, %77, %cst_39 [1] : vector<2x10xf32> to vector<2xf32>
    %82 = vector.shape_cast %81 : vector<2xf32> to vector<2x1xf32>
    %83 = vector.broadcast %82 : vector<2x1xf32> to vector<2x128xf32>
    %84 = arith.divf %80, %83 : vector<2x128xf32>
    %85 = tpu.concatenate %67, %49, %84 in 1 : vector<2x128xf32>, vector<2x128xf32>, vector<2x128xf32> -> vector<2x384xf32>
    %c0_40 = arith.constant 0 : index
    %c0_41 = arith.constant 0 : index
    %86 = vector.load %arg9[%c0_40, %c0_41] : memref<384x128xf32, #tpu.memory_space<vmem>>, vector<384x128xf32>
    %cst_42 = arith.constant dense<0.000000e+00> : vector<2x128xf32>
    %87 = tpu.matmul %85, %86, %cst_42 {dimension_numbers = #tpu.dot_dimension_numbers<[1], [0], [0], [1], [0, 0, 1, 1], [], []>} : vector<2x384xf32>, vector<384x128xf32>, vector<2x128xf32> -> vector<2x128xf32>
    %c0_43 = arith.constant 0 : index
    %c0_44 = arith.constant 0 : index
    %88 = vector.load %arg11[%c0_43, %c0_44] : memref<1x256xf32, #tpu.memory_space<vmem>>, vector<1x128xf32>
    %89 = vector.broadcast %88 : vector<1x128xf32> to vector<2x128xf32>
    %90 = arith.addf %87, %89 : vector<2x128xf32>
    %cst_45 = arith.constant 0.000000e+00 : f32
    %91 = vector.broadcast %cst_45 : f32 to vector<2x128xf32>
    %92 = arith.maximumf %90, %91 : vector<2x128xf32>
    %c0_46 = arith.constant 0 : index
    %c0_47 = arith.constant 0 : index
    %93 = vector.load %arg10[%c0_46, %c0_47] : memref<128x128xf32, #tpu.memory_space<vmem>>, vector<128x128xf32>
    %cst_48 = arith.constant dense<0.000000e+00> : vector<2x128xf32>
    %94 = tpu.matmul %92, %93, %cst_48 {dimension_numbers = #tpu.dot_dimension_numbers<[1], [0], [0], [1], [0, 0, 1, 1], [], []>} : vector<2x128xf32>, vector<128x128xf32>, vector<2x128xf32> -> vector<2x128xf32>
    %c0_49 = arith.constant 0 : index
    %c128 = arith.constant 128 : index
    %95 = vector.load %arg11[%c0_49, %c128] : memref<1x256xf32, #tpu.memory_space<vmem>>, vector<1x128xf32>
    %96 = vector.broadcast %95 : vector<1x128xf32> to vector<2x128xf32>
    %97 = arith.addf %94, %96 : vector<2x128xf32>
    %c0_50 = arith.constant 0 : index
    %c0_51 = arith.constant 0 : index
    %98 = vector.load %arg12[%c0_50, %c0_51] : memref<2x128xf32, #tpu.memory_space<vmem>>, vector<2x128xf32>
    tpu.vector_store %arg12[%c0_50, %c0_51], %97 {strides = array<i32>} : memref<2x128xf32, #tpu.memory_space<vmem>>, vector<2x128xf32>,
    return
  }
  func.func @transform_0(%arg0: i32, %arg1: memref<2xi32, #tpu.memory_space<smem>>) -> (i32, i32) {
    %c0_i32 = arith.constant 0 : i32
    %c0_i32_0 = arith.constant 0 : i32
    %c0_i32_1 = arith.constant 0 : i32
    return %c0_i32, %c0_i32_0 : i32, i32
  }
  func.func @transform_1(%arg0: i32, %arg1: memref<2xi32, #tpu.memory_space<smem>>) -> (i32, i32, i32) {
    %c0_i32 = arith.constant 0 : i32
    %c0_i32_0 = arith.constant 0 : i32
    %c0_i32_1 = arith.constant 0 : i32
    %c0_i32_2 = arith.constant 0 : i32
    return %c0_i32, %c0_i32_0, %c0_i32_1 : i32, i32, i32
  }
  func.func @transform_2(%arg0: i32, %arg1: memref<2xi32, #tpu.memory_space<smem>>) -> (i32, i32, i32) {
    %c0_i32 = arith.constant 0 : i32
    %c0_i32_0 = arith.constant 0 : i32
    %c0_i32_1 = arith.constant 0 : i32
    %c0_i32_2 = arith.constant 0 : i32
    return %c0_i32, %c0_i32_0, %c0_i32_1 : i32, i32, i32
  }
  func.func @transform_3(%arg0: i32, %arg1: memref<2xi32, #tpu.memory_space<smem>>) -> (i32, i32) {
    %c0_i32 = arith.constant 0 : i32
    %c0_i32_0 = arith.constant 0 : i32
    %c0_i32_1 = arith.constant 0 : i32
    return %c0_i32, %c0_i32_0 : i32, i32
  }
  func.func @transform_4(%arg0: i32, %arg1: memref<2xi32, #tpu.memory_space<smem>>) -> (i32, i32) {
    %c0_i32 = arith.constant 0 : i32
    %c0_i32_0 = arith.constant 0 : i32
    %c0_i32_1 = arith.constant 0 : i32
    return %c0_i32, %c0_i32_0 : i32, i32
  }
  func.func @transform_5(%arg0: i32, %arg1: memref<2xi32, #tpu.memory_space<smem>>) -> (i32, i32) {
    %c0_i32 = arith.constant 0 : i32
    %c0_i32_0 = arith.constant 0 : i32
    %c0_i32_1 = arith.constant 0 : i32
    return %c0_i32, %c0_i32_0 : i32, i32
  }
  func.func @transform_6(%arg0: i32, %arg1: memref<2xi32, #tpu.memory_space<smem>>) -> (i32, i32) {
    %c0_i32 = arith.constant 0 : i32
    %c0_i32_0 = arith.constant 0 : i32
    %c0_i32_1 = arith.constant 0 : i32
    return %c0_i32, %c0_i32_0 : i32, i32
  }
  func.func @transform_7(%arg0: i32, %arg1: memref<2xi32, #tpu.memory_space<smem>>) -> (i32, i32) {
    %c0_i32 = arith.constant 0 : i32
    %c0_i32_0 = arith.constant 0 : i32
    %c0_i32_1 = arith.constant 0 : i32
    return %c0_i32, %c0_i32_0 : i32, i32
  }
  func.func @transform_8(%arg0: i32, %arg1: memref<2xi32, #tpu.memory_space<smem>>) -> (i32, i32) {
    %c0_i32 = arith.constant 0 : i32
    %c0_i32_0 = arith.constant 0 : i32
    %c0_i32_1 = arith.constant 0 : i32
    return %c0_i32, %c0_i32_0 : i32, i32
  }
  func.func @transform_9(%arg0: i32, %arg1: memref<2xi32, #tpu.memory_space<smem>>) -> (i32, i32) {
    %c0_i32 = arith.constant 0 : i32
    %c0_i32_0 = arith.constant 0 : i32
    %c0_i32_1 = arith.constant 0 : i32
    return %c0_i32, %c0_i32_0 : i32, i32
  }
  func.func @transform_10(%arg0: i32, %arg1: memref<2xi32, #tpu.memory_space<smem>>) -> (i32, i32) {
    %c0_i32 = arith.constant 0 : i32
    %c0_i32_0 = arith.constant 0 : i32
    %c0_i32_1 = arith.constant 0 : i32
    return %c0_i32, %c0_i32_0 : i32, i32
  }
  func.func @transform_11(%arg0: i32, %arg1: memref<2xi32, #tpu.memory_space<smem>>) -> (i32, i32) {
    %c0_i32 = arith.constant 0 : i32
    %c0_i32_0 = arith.constant 0 : i32
    %c0_i32_1 = arith.constant 0 : i32
    return %c0_i32, %c0_i32_0 : i32, i32
  }
}

</mosaic_0001>

<bundles_post_ra>
// kernel: code_attn_gru_decoder.1
= control target key start
LH: loop header
LB: loop body
LE: loop exit
PB: predicated region body
PF: predicated region fallthrough
CT: control target
= control target key end

     0   :  { %s2595_s0 = inlined_call_operand.vmem [shape: s32[2], index: 0, kind: input, shape index: {}]   ;;  %s2596_s1 = inlined_call_operand.vmem [shape: f32[2,128], index: 1, kind: input, shape index: {}]   ;;  %s2597_s2 = inlined_call_operand.vmem [shape: f32[2,12,128], index: 2, kind: input, shape index: {}]   ;;  %s2598_s3 = inlined_call_operand.vmem [shape: f32[2,10,128], index: 3, kind: input, shape index: {}]   ;;  %s2599_s4 = inlined_call_operand.vmem [shape: f32[64,16], index: 4, kind: input, shape index: {}]   ;;  %s2600_s5 = inlined_call_operand.vmem [shape: f32[16,384], index: 5, kind: input, shape index: {}]   ;;  %s2601_s6 = inlined_call_operand.vmem [shape: f32[128,384], index: 6, kind: input, shape index: {}]   ;;  %s2602_s7 = inlined_call_operand.vmem [shape: f32[2,384], index: 7, kind: input, shape index: {}]   ;;  %s2603_s8 = inlined_call_operand.vmem [shape: f32[384,128], index: 8, kind: input, shape index: {}]   ;;  %s2604_s9 = inlined_call_operand.vmem [shape: f32[128,128], index: 9, kind: input, shape index: {}]   ;;  %s2605_s10 = inlined_call_operand.vmem [shape: f32[1,256], index: 10, kind: input, shape index: {}]   ;;  %s2606_s11 = inlined_call_operand.hbm [shape: f32[2,128], index: 11, kind: output, shape index: {0}]   ;;  %s2607_s12 = inlined_call_operand.hbm [shape: f32[2,128], index: 12, kind: output, shape index: {1}]  }
   0x1   :  { %s18_s23 = sshll.u32 %s2595_s0, 4  ;;  %s19_s23 = int_to_ptr.vmem [resolvable:$true] %s18_s23 }
   0x2   :  { %s1847_s24 = scalar_lea.vmem %s19_s23, 16  ;;  %p1852_p1 = scmp.lt.s32.totalorder %s19_s23, %s19_s23 }
   0x3   :  { %p1848_p0 = scmp.ne.s32.totalorder %s19_s23, %s1847_s24  ;;  %p1853_p2 = scmp.lt.s32.totalorder %s1847_s24, %s1847_s24 }
   0x5   :  { %p1854_p3 = por %p1853_p2, %p1852_p1 }
   0x7   :  { %p1855_p4 = pnand %p1854_p3, %p1848_p0 }
   0x9   :  { %1858 = shalt.err (!%p1855_p4)  }
   0xa   :  { %s1909_s25 = smov [#allocation4]  }
   0xb   :  { %21 = dma.vmem_to_smem %s19_s23, 16, %s1909_s25, [#allocation3] }
   0xc   :  { %1903 = dma.done.wait [#allocation3], 16 }
   0xd   :  { %1904 = vsyncadd [#allocation3], 4294967280 }
   0xe   :  { %23 = sfence }
   0xf   :  { %24 = vsyncpa [#allocation6], 0  ;;  %v234_v0 = vld [vmem:[%s2601_s6 + $0x8] sm:$0xff]  ;;  %v237_v1 = vld [vmem:[%s2601_s6 + $0x20] sm:$0xff]  ;;  %v1910_v7 = vmov 0.0   ;;  %s2005_s19 = sld [smem:[#allocation4]] }
  0x10   :  { %v233_v2 = vld [vmem:[%s2601_s6] sm:$0xff]  ;;  %v1644_v3 = vpack.c.bf16 %v237_v1, %v234_v0  ;;  %v236_v4 = vld [vmem:[%s2601_s6 + $0x18] sm:$0xff]  ;;  %v243_v6 = vld [vmem:[%s2601_s6 + $0x50] sm:$0xff]  ;;  %156 = vmatprep.mubr.f32.mxu1 %v1910_v7  ;;  %363 = vmatprep.mubr.f32.mxu0 %v1910_v7  ;;  %s2017_s26 = sld [smem:[#allocation4 + $0x1]]  ;;  %v1911_v32 = vmov 0.0|0.0   ;;  %vm53_vm0 = vcmask 122880  }
  0x11   :  { %v240_v5 = vld [vmem:[%s2601_s6 + $0x38] sm:$0xff]  ;;  %v1646_v8 = vpack.c.bf16 %v236_v4, %v233_v2  ;;  %v239_v10 = vld [vmem:[%s2601_s6 + $0x30] sm:$0xff]  ;;  %v242_v11 = vld [vmem:[%s2601_s6 + $0x48] sm:$0xff] }
  0x12   :  { %v1648_v9 = vpack.c.bf16 %v243_v6, %v240_v5  ;;  %v246_v12 = vld [vmem:[%s2601_s6 + $0x68] sm:$0xff]  ;;  %1645 = vmatprep.subr.bf16.mxu0 %v1644_v3  ;;  %v249_v13 = vld [vmem:[%s2601_s6 + $0x80] sm:$0xff]  ;;  %v1650_v14 = vpack.c.bf16 %v242_v11, %v239_v10  ;;  %v248_v17 = vld [vmem:[%s2601_s6 + $0x78] sm:$0xff] }
  0x13   :  { %1647 = vmatpush1.bf16.msra.mxu0 %v1646_v8  ;;  %v1652_v15 = vpack.c.bf16 %v249_v13, %v246_v12  ;;  %v245_v16 = vld [vmem:[%s2601_s6 + $0x60] sm:$0xff]  ;;  %v252_v18 = vld [vmem:[%s2601_s6 + $0x98] sm:$0xff]  ;;  %v255_v19 = vld [vmem:[%s2601_s6 + $0xb0] sm:$0xff] }
  0x14   :  { %1649 = vmatprep.subr.bf16.mxu0 %v1648_v9  ;;  %v66_v20 = vld [vmem:[%s2600_s5 + $0x8] sm:$0xff]  ;;  %v69_v21 = vld [vmem:[%s2600_s5 + $0x20] sm:$0xff]  ;;  %v68_v24 = vld [vmem:[%s2600_s5 + $0x18] sm:$0xff]  ;;  %v1654_v25 = vpack.c.bf16 %v248_v17, %v245_v16  ;;  %v1656_v27 = vpack.c.bf16 %v255_v19, %v252_v18 }
  0x15   :  { %v1637_v22 = vpack.c.bf16 %v69_v21, %v66_v20  ;;  %v65_v23 = vld [vmem:[%s2600_s5] sm:$0xff]  ;;  %p47_p5 = scmp.gt.s32.totalorder %s2005_s19, 0  ;;  %p1366_p6 = scmp.lt.s32.totalorder %s2005_s19, 63  ;;  %v251_v28 = vld [vmem:[%s2601_s6 + $0x90] sm:$0xff]  ;;  %v254_v29 = vld [vmem:[%s2601_s6 + $0xa8] sm:$0xff] }
  0x16   :  { %v1639_v26 = vpack.c.bf16 %v68_v24, %v65_v23  ;;  %p56_p7 = scmp.gt.s32.totalorder %s2017_s26, 0  ;;  %p1372_p8 = scmp.lt.s32.totalorder %s2017_s26, 63  ;;  %v258_v30 = vld [vmem:[%s2601_s6 + $0xc8] sm:$0xff]  ;;  %v261_v31 = vld [vmem:[%s2601_s6 + $0xe0] sm:$0xff]  ;;  %v1658_v33 = vpack.c.bf16 %v254_v29, %v251_v28  ;;  %v260_v36 = vld [vmem:[%s2601_s6 + $0xd8] sm:$0xff] }
  0x17   :  { %1651 = vmatpush1.bf16.msra.mxu0 %v1650_v14  ;;  %1638 = vmatprep.subr.bf16.mxu1 %v1637_v22  ;;  %s48_s13 = scalar_select %p47_p5, %s2005_s19, 0  ;;  %v1660_v34 = vpack.c.bf16 %v261_v31, %v258_v30  ;;  %v257_v35 = vld [vmem:[%s2601_s6 + $0xc0] sm:$0xff]  ;;  %v264_v37 = vld [vmem:[%s2601_s6 + $0xf8] sm:$0xff]  ;;  %v267_v38 = vld [vmem:[%s2601_s6 + $0x110] sm:$0xff] }
  0x18   :  { %1653 = vmatprep.subr.bf16.mxu0 %v1652_v15  ;;  %1640 = vmatpush1.bf16.msra.mxu1 %v1639_v26  ;;  %s57_s18 = scalar_select %p56_p7, %s2017_s26, 0  ;;  %v1662_v41 = vpack.c.bf16 %v260_v36, %v257_v35  ;;  %v1664_v42 = vpack.c.bf16 %v267_v38, %v264_v37  ;;  %v263_v43 = vld [vmem:[%s2601_s6 + $0xf0] sm:$0xff]  ;;  %v266_v44 = vld [vmem:[%s2601_s6 + $0x108] sm:$0xff]  ;;  %v273_v48 = vld [vmem:[%s2601_s6 + $0x140] sm:$0xff] }
  0x19   :  { %1641 = vmatprep.subr.bf16.mxu1 %v1911_v32  ;;  %s2613_s13 = smov (!%p1366_p6, %s48_s13), 63  ;;  %v67_v45 = vld [vmem:[%s2600_s5 + $0x10] sm:$0xff]  ;;  %v70_v46 = vld [vmem:[%s2600_s5 + $0x28] sm:$0xff] }
  0x1a   :  { %s2615_s18 = smov (!%p1372_p8, %s57_s18), 63  ;;  %s51_s19 = scalar_lea.vmem %s2599_s4, %s2613_s13  ;;  %v270_v47 = vld [vmem:[%s2601_s6 + $0x128] sm:$0xff] }
  0x1b   :  { %1655 = vmatpush1.bf16.msra.mxu0 %v1654_v25  ;;  %v52_v39 = vld [vmem:[%s51_s19] sm:$0x1]  ;;  %s60_s14 = scalar_lea.vmem %s2599_s4, %s2615_s18 }
  0x1c   :  { %1657 = vmatprep.subr.bf16.mxu0 %v1656_v27  ;;  %54 = vst.msk [vmem:[#allocation2] sm:$0x1] %vm53_vm0, %v52_v39  ;;  %v61_v40 = vld [vmem:[%s60_s14] sm:$0x1] }
  0x1d   :  { %62 = vst.msk [vmem:[#allocation2 + $0x1] sm:$0x1] %vm53_vm0, %v61_v40 }
  0x1f   :  { %1659 = vmatpush1.bf16.msra.mxu0 %v1658_v33 }
  0x20   :  { %1661 = vmatprep.subr.bf16.mxu0 %v1660_v34 }
  0x21   :  { %25 = vsyncpa [#allocation8], 0  ;;  %v1666_v49 = vpack.c.bf16 %v266_v44, %v263_v43  ;;  %vm88_vm1 = vcmask 130048   ;;  %v1642_v50 = vpack.c.bf16 %v70_v46, %v67_v45  ;;  %v1668_v51 = vpack.c.bf16 %v273_v48, %v270_v47  ;;  %v269_v52 = vld [vmem:[%s2601_s6 + $0x120] sm:$0xff]  ;;  %v272_v53 = vld [vmem:[%s2601_s6 + $0x138] sm:$0xff]  ;;  %s1916_s22 = smov [#allocation7]  }
  0x22   :  { %v235_v54 = vld [vmem:[%s2601_s6 + $0x10] sm:$0xff]  ;;  %v238_v55 = vld [vmem:[%s2601_s6 + $0x28] sm:$0xff]  ;;  %v276_v56 = vld [vmem:[%s2601_s6 + $0x158] sm:$0xff]  ;;  %v1670_v59 = vpack.c.bf16 %v272_v53, %v269_v52  ;;  %vm1912_vm2 = vmmov 0   ;;  %vm505_vm3 = vcmask 1043456   ;;  %vm1913_vm4 = vmmov 1  }
  0x23   :  { %1663 = vmatpush1.bf16.msra.mxu0 %v1662_v41  ;;  %v279_v57 = vld [vmem:[%s2601_s6 + $0x170] sm:$0xff]  ;;  %v1677_v60 = vpack.c.bf16 %v238_v55, %v235_v54  ;;  %v278_v63 = vld [vmem:[%s2601_s6 + $0x168] sm:$0xff]  ;;  %v241_v0 = vld [vmem:[%s2601_s6 + $0x40] sm:$0xff]  ;;  %v73_v28 = vlaneseq  ;;  %vm778_vm6 = vcmask 1041408   ;;  %vm529_vm7 = vcmask 130112   ;;  %s1352_s23 = sshll.u32 %s1916_s22, 4  ;;  %s1353_s23 = int_to_ptr.vmem [resolvable:$true] %s1352_s23 }
  0x24   :  { %1665 = vmatprep.subr.bf16.mxu0 %v1664_v42  ;;  %v63_v58 = vld [vmem:[#allocation2] sm:$0x3]  ;;  %v1672_v61 = vpack.c.bf16 %v279_v57, %v276_v56  ;;  %v275_v62 = vld [vmem:[%s2601_s6 + $0x150] sm:$0xff]  ;;  %v244_v1 = vld [vmem:[%s2601_s6 + $0x58] sm:$0xff]  ;;  %vm540_vm8 = vcmask 1041409   ;;  %vm543_vm9 = vcmask 91136   ;;  %p1864_p10 = scmp.lt.s32.totalorder %s1353_s23, %s1353_s23 }
  0x25   :  { %1377 = vmatmul.mubr.msk.f32.vlgmr.msra.gmra.mrb[0].mxu1 %vm88_vm1, %v63_v58  ;;  %v1674_v2 = vpack.c.bf16 %v278_v63, %v275_v62  ;;  %v1680_v3 = vpack.c.bf16 %v244_v1, %v241_v0  ;;  %v247_v4 = vld [vmem:[%s2601_s6 + $0x70] sm:$0xff]  ;;  %v250_v5 = vld [vmem:[%s2601_s6 + $0x88] sm:$0xff]  ;;  %v2152_v6 = vld [vmem:[%s2596_s1] sm:$0x3]  ;;  %v2217_v29 = vshrl.u32 %v73_v28, 7  ;;  %vm811_vm10 = vcmask 74752  }
  0x26   :  { %1643 = vmatpush3.bf16.msra.mxu1 %v1642_v50  ;;  %1501 = vmatprep.mubr.msk.f32.mxu1 %vm1912_vm2, %v1910_v7  ;;  %v1683_v8 = vpack.c.bf16 %v250_v5, %v247_v4  ;;  %v253_v9 = vld [vmem:[%s2601_s6 + $0xa0] sm:$0xff]  ;;  %v256_v10 = vld [vmem:[%s2601_s6 + $0xb8] sm:$0xff]  ;;  %v259_v12 = vld [vmem:[%s2601_s6 + $0xd0] sm:$0xff]  ;;  %vm587_vm11 = vcmask 97280   ;;  %vm855_vm13 = vcmask 80896  }
  0x27   :  { %1667 = vmatpush1.bf16.msra.mxu0 %v1666_v49  ;;  %1676 = vmatprep.subr.bf16.mxu1 %v1911_v32  ;;  %v1686_v11 = vpack.c.bf16 %v256_v10, %v253_v9  ;;  %v262_v13 = vld [vmem:[%s2601_s6 + $0xe8] sm:$0xff]  ;;  %v265_v15 = vld [vmem:[%s2601_s6 + $0x100] sm:$0xff]  ;;  %v268_v16 = vld [vmem:[%s2601_s6 + $0x118] sm:$0xff]  ;;  %v2220_v30 = vsub.s32 0, %v2217_v29  ;;  %v2226_v33 = vsub.s32 1, %v2217_v29  ;;  %v83_v55 = vsub.s32 2, %v2217_v29 }
  0x28   :  { %1669 = vmatprep.subr.bf16.mxu0 %v1668_v51  ;;  %v1689_v14 = vpack.c.bf16 %v262_v13, %v259_v12  ;;  %v1692_v17 = vpack.c.bf16 %v268_v16, %v265_v15  ;;  %v271_v18 = vld [vmem:[%s2601_s6 + $0x130] sm:$0xff]  ;;  %v274_v19 = vld [vmem:[%s2601_s6 + $0x148] sm:$0xff]  ;;  %v277_v21 = vld [vmem:[%s2601_s6 + $0x160] sm:$0xff] }
  0x29   :  { %1502 = vmatmul.mubr.msk.f32.vlgmr.msra.gmra.mrb[2].mxu1 %vm88_vm1, %v63_v58  ;;  %v1695_v20 = vpack.c.bf16 %v274_v19, %v271_v18  ;;  %v280_v22 = vld [vmem:[%s2601_s6 + $0x178] sm:$0xff]  ;;  %v2198_v24 = vld [vmem:[%s2597_s2] sm:$0xff]  ;;  %v2203_v25 = vld [vmem:[%s2597_s2 + $0x8] sm:$0xf] }
  0x2a   :  { %1678 = vmatpush3.bf16.msra.mxu1 %v1677_v60  ;;  %1536 = vmatprep.mubr.msk.f32.mxu1 %vm1912_vm2, %v1910_v7  ;;  %v1698_v23 = vpack.c.bf16 %v280_v22, %v277_v21  ;;  %v1701_v26 = vpack.c.bf16 %v2203_v25, %v2198_v24  ;;  %vm2209_vm5 = vmpackc.low %vm505_vm3, %vm1913_vm4  ;;  %v71_v31 = vld [vmem:[%s2602_s7] ss:$2 sm:$0x7]  ;;  %v1379_v38 = vld [vmem:[%s2602_s7 + $0x1] ss:$2 sm:$0x7] }
  0x2b   :  { %1671 = vmatpush1.bf16.msra.mxu0 %v1670_v59  ;;  %1679 = vmatprep.subr.bf16.mxu1 %v1911_v32  ;;  %v76_v36 = vrot.slane %v71_v31, %v2220_v30  ;;  %v80_v37 = vrot.slane %v71_v31, %v2226_v33  ;;  %v287_v42 = vrot.slane %v1379_v38, %v2220_v30  ;;  %vm2325_vm12 = vmpackc.low %vm778_vm6, %vm1913_vm4 }
  0x2c   :  { %1673 = vmatprep.subr.bf16.mxu0 %v1672_v61  ;;  %v291_v44 = vrot.slane %v1379_v38, %v2226_v33  ;;  %v295_v57 = vrot.slane %v1379_v38, %v83_v55  ;;  %v84_v58 = vrot.slane %v71_v31, %v83_v55  ;;  %v2271_v38 = vld [vmem:[%s2598_s3 + $0x18] sm:$0x3] }
  0x2e   :  { %1681 = vmatpush3.bf16.msra.mxu1 %v1680_v3  ;;  %v1914_v3 = vmov 1966171168  }
  0x2f   :  { %1675 = vmatpush1.bf16.msra.mxu0 %v1674_v2  ;;  %1682 = vmatprep.subr.bf16.mxu1 %v1911_v32  ;;  %v468_v4 = vunpack.c.l.s4 %v1914_v3 }
  0x32   :  { %364 = vmatmul.mubr.f32.vlgmr.msra.gmra.mrb[0].mxu0 %v2152_v6  ;;  %1684 = vmatpush3.bf16.msra.mxu1 %v1683_v8  ;;  %v469_v8 = vunpack.c.0.s8 %v468_v4 }
  0x33   :  { %1685 = vmatprep.subr.bf16.mxu1 %v1911_v32 }
  0x34   :  { %v472_v13 = vsub.s32 %v469_v8, %v2217_v29  ;;  %v1915_v8 = vmov 0  }
  0x35   :  { %1812 = vset.pattern.permute.xlu1 %v1915_v8  ;;  %1811 = vset.pattern.permute.xlu0 %v1915_v8 }
  0x36   :  { %1687 = vmatpush3.bf16.msra.mxu1 %v1686_v11 }
  0x37   :  { %1688 = vmatprep.subr.bf16.mxu1 %v1911_v32 }
  0x3a   :  { %1690 = vmatpush3.bf16.msra.mxu1 %v1689_v14 }
  0x3b   :  { %1691 = vmatprep.subr.bf16.mxu1 %v1911_v32 }
  0x3e   :  { %1693 = vmatpush3.bf16.msra.mxu1 %v1692_v17 }
  0x3f   :  { %1694 = vmatprep.subr.bf16.mxu1 %v1911_v32 }
  0x42   :  { %1696 = vmatpush3.bf16.msra.mxu1 %v1695_v20  ;;  %v2242_v20 = vld [vmem:[%s2597_s2 + $0x10] sm:$0xff] }
  0x43   :  { %1697 = vmatprep.subr.bf16.mxu1 %v1911_v32 }
  0x46   :  { %1699 = vmatpush3.bf16.msra.mxu1 %v1698_v23 }
  0x47   :  { %1700 = vmatprep.subr.bf16.mxu1 %v1911_v32 }
  0x49   :  { %1537 = vmatmul.mubr.f32.vlgmr.msra.gmra.mrb[4].mxu1 %v2152_v6 }
  0x4a   :  { %1543 = vmatprep.mubr.msk.f32.mxu1 %vm1912_vm2, %v1910_v7  ;;  %1703 = vmatpush3.bf16.msk.msra.mxu1 %vm2209_vm5, %v1701_v26 }
  0x4b   :  { %1704 = vmatprep.subr.bf16.mxu1 %v1911_v32 }
  0xf8   :  { %v158_v34 = vpop.f32.mrb[0].mxu1 }
  0xf9   :  { %v160_v35 = vpop.f32.mrb[1].mxu1  ;;  %v159_v41 = vadd.f32 %v158_v34, %v76_v36  ;;  %v2257_v34 = vld [vmem:[%s2598_s3 + $0x8] sm:$0x3] }
  0xfa   :  { %v161_v43 = vadd.f32 %v160_v35, %v80_v37  ;;  %v2263_v35 = vld [vmem:[%s2598_s3] sm:$0xff] }
  0xfb   :  { %v1797_v45 = vadd.f32 %v287_v42, %v159_v41 }
  0xfc   :  { %v229_v39 = vpop.f32.mrb[2].mxu1  ;;  %v1800_v47 = vadd.f32 %v291_v44, %v161_v43  ;;  %v519_v44 = vand.u32 127, %v73_v28 }
  0xfd   :  { %v1503_v40 = vpop.f32.mrb[3].mxu1  ;;  %v230_v0 = vadd.f32 %v229_v39, %v84_v58  ;;  %v2276_v39 = vld [vmem:[%s2598_s3 + $0x10] sm:$0xff]  ;;  %s1859_s3 = scalar_lea.vmem %s1353_s23, 32 }
  0xfe   :  { %p1860_p9 = scmp.ne.s32.totalorder %s1353_s23, %s1859_s3  ;;  %p1865_p11 = scmp.lt.s32.totalorder %s1859_s3, %s1859_s3 }
 0x100   :  { %p1866_p12 = por %p1865_p11, %p1864_p10 }
 0x102   :  { %p1867_p13 = pnand %p1866_p12, %p1860_p9 }
 0x105   :  { %v365_v46 = vpop.f32.mrb[0].mxu0 }
 0x106   :  { %v1798_v48 = vadd.f32 %v1797_v45, %v365_v46  ;;  %v367_v49 = vpop.f32.mrb[1].mxu0  ;;  %v524_v45 = vadd.s32 4294967288, %v519_v44 }
 0x107   :  { %v1801_v50 = vadd.f32 %v1800_v47, %v367_v49  ;;  %v2287_v49 = vsub.s32 %v519_v44, %v2217_v29 }
 0x108   :  { %v1380_v51 = vmul.f32 -1.442695, %v1798_v48  ;;  %v2284_v47 = vsub.s32 %v524_v45, %v2217_v29 }
 0x109   :  { %v1381_v52 = vmul.f32 -1.442695, %v1801_v50 }
 0x10a   :  { %1813 = vpow2.f32 %v1380_v51 }
 0x10b   :  { %1815 = vpow2.f32 %v1381_v52 }
 0x114   :  { %v1814_v53 = vpop.eup %1813 }
 0x115   :  { %v444_v54 = vadd.f32 1.0, %v1814_v53  ;;  %v1816_v56 = vpop.eup %1815 }
 0x116   :  { %v451_v59 = vadd.f32 1.0, %v1816_v56 }
 0x117   :  { %1817 = vrcp.f32 %v444_v54 }
 0x118   :  { %1819 = vrcp.f32 %v451_v59 }
 0x11c   :  { %v436_v60 = vpop.f32.mrb[4].mxu1 }
 0x11d   :  { %v437_v61 = vadd.f32 %v436_v60, %v295_v57  ;;  %v1538_v62 = vpop.f32.mrb[5].mxu1 }
 0x121   :  { %v1818_v63 = vpop.eup %1817 }
 0x122   :  { %v454_v1 = vmul.f32 %v1818_v63, %v437_v61  ;;  %v1820_v5 = vpop.eup %1819 }
 0x123   :  { %v457_v9 = vsub.f32 1.0, %v1820_v5  ;;  %v459_v12 = vmul.f32 %v1820_v5, %v2152_v6  ;;  %v2248_v6 = vld [vmem:[%s2597_s2 + $0x18] sm:$0xf] }
 0x124   :  { %v455_v2 = vadd.f32 %v454_v1, %v230_v0 }
 0x126   :  { %1821 = vtanh.f32 %v455_v2 }
 0x130   :  { %v1822_v10 = vpop.eup %1821 }
 0x131   :  { %v458_v11 = vmul.f32 %v1822_v10, %v457_v9 }
 0x133   :  { %v460_v14 = vadd.f32 %v459_v12, %v458_v11 }
 0x135   :  { %v473_v15 = vrot.slane %v460_v14, %v472_v13  ;;  %1165 = vmatprep.mubr.f32.mxu0 %v460_v14  ;;  %461 = vst [vmem:[#allocation7] sm:$0x3] %v460_v14 }
 0x137   :  { %v474_v16 = vcombine.high %v473_v15, %v473_v15  ;;  %v481_v17 = vrot.slane %v473_v15, %v472_v13 }
 0x139   :  { %v492_v18 = vrot.slane %v481_v17, %v2220_v30  ;;  %v488_v19 = vrot.slane %v474_v16, %v472_v13 }
 0x13b   :  { %v499_v21 = vmul.f32 %v492_v18, %v2198_v24  ;;  %v496_v22 = vrot.slane %v488_v19, %v2220_v30  ;;  %v500_v23 = vmul.f32 %v492_v18, %v2203_v25  ;;  %v773_v36 = vmul.f32 %v2257_v34, %v492_v18 }
 0x13c   :  { %v772_v37 = vmul.f32 %v2263_v35, %v492_v18 }
 0x13d   :  { %503 = vadd.xlane.f32.xlu0 %v499_v21  ;;  %v501_v26 = vmul.f32 %v496_v22, %v2242_v20  ;;  %v502_v31 = vmul.f32 %v496_v22, %v2248_v6  ;;  %v506_v24 = vsel %vm505_vm3, %v500_v23, 0.0  ;;  %v779_v40 = vsel %vm778_vm6, %v773_v36, 0.0 }
 0x13e   :  { %v775_v41 = vmul.f32 %v2271_v38, %v496_v22  ;;  %v774_v42 = vmul.f32 %v2276_v39, %v496_v22 }
 0x13f   :  { %509 = vadd.xlane.f32.xlu1 %v501_v26  ;;  %v511_v25 = vsel %vm505_vm3, %v502_v31, 0.0 }
 0x140   :  { %v784_v43 = vsel %vm778_vm6, %v775_v41, 0.0 }
 0x141   :  { %507 = vadd.xlane.f32.xlu0 %v506_v24 }
 0x143   :  { %512 = vadd.xlane.f32.xlu1 %v511_v25 }
 0x145   :  { %776 = vadd.xlane.f32.xlu0 %v772_v37 }
 0x147   :  { %780 = vadd.xlane.f32.xlu1 %v779_v40 }
 0x149   :  { %782 = vadd.xlane.f32.xlu0 %v774_v42 }
 0x14b   :  { %785 = vadd.xlane.f32.xlu1 %v784_v43 }
 0x1ca   :  { %v504_v46 = vpop.xlane.xlu0 %503 }
 0x1cb   :  { %v523_v53 = vrot.slane %v504_v46, %v2287_v49 }
 0x1cc   :  { %v510_v48 = vpop.xlane.xlu1 %509 }
 0x1cd   :  { %v534_v54 = vrot.slane %v510_v48, %v2287_v49 }
 0x1ce   :  { %v508_v50 = vpop.xlane.xlu0 %507 }
 0x1cf   :  { %v528_v51 = vrot.slane %v508_v50, %v2284_v47 }
 0x1d0   :  { %v513_v52 = vpop.xlane.xlu1 %512 }
 0x1d1   :  { %v538_v28 = vrot.slane %v513_v52, %v2284_v47  ;;  %v530_v56 = vsel %vm529_vm7, %v528_v51, %v523_v53  ;;  %v1705_v53 = vpack.c.bf16 %v2248_v6, %v2242_v20 }
 0x1d2   :  { %v777_v55 = vpop.xlane.xlu0 %776 }
 0x1d3   :  { %v539_v57 = vsel %vm529_vm7, %v538_v28, %v534_v54  ;;  %v794_v63 = vrot.slane %v777_v55, %v2287_v49 }
 0x1d4   :  { %v781_v29 = vpop.xlane.xlu1 %780  ;;  %v541_v58 = vsel %vm540_vm8, %v539_v57, %v530_v56  ;;  %v1709_v57 = vpack.c.bf16 %v2257_v34, %v2263_v35  ;;  %v1713_v35 = vpack.c.bf16 %v2271_v38, %v2276_v39 }
 0x1d5   :  { %v544_v59 = vsel %vm543_vm9, %v541_v58, -inf  ;;  %v798_v61 = vrot.slane %v781_v29, %v2284_v47 }
 0x1d6   :  { %v783_v60 = vpop.xlane.xlu0 %782  ;;  %545 = vmax.xlane.f32.xlu0 %v544_v59 }
 0x1d7   :  { %v803_v0 = vrot.slane %v783_v60, %v2287_v49  ;;  %v799_v2 = vsel %vm529_vm7, %v798_v61, %v794_v63 }
 0x1d8   :  { %v786_v62 = vpop.xlane.xlu1 %785 }
 0x1d9   :  { %v807_v1 = vrot.slane %v786_v62, %v2284_v47 }
 0x1db   :  { %v808_v3 = vsel %vm529_vm7, %v807_v1, %v803_v0 }
 0x1dc   :  { %v809_v4 = vsel %vm540_vm8, %v808_v3, %v799_v2 }
 0x1dd   :  { %v812_v5 = vsel %vm811_vm10, %v809_v4, -inf }
 0x1de   :  { %813 = vmax.xlane.f32.xlu1 %v812_v5  ;;  %v1062_v5 = vld [vmem:[%s2603_s8 + $0x80] sm:$0xff] }
 0x263   :  { %v546_v9 = vpop.xlane.xlu0 %545 }
 0x264   :  { %v551_v10 = vrot.slane %v546_v9, %v2220_v30  ;;  %v555_v11 = vrot.slane %v546_v9, %v2226_v33  ;;  %v1047_v9 = vld [vmem:[%s2603_s8 + $0x8] sm:$0xff] }
 0x266   :  { %v558_v12 = vsub.f32 %v504_v46, %v551_v10  ;;  %v559_v13 = vsub.f32 %v508_v50, %v551_v10  ;;  %v560_v14 = vsub.f32 %v510_v48, %v555_v11  ;;  %v561_v17 = vsub.f32 %v513_v52, %v555_v11  ;;  %v1064_v10 = vld [vmem:[%s2603_s8 + $0x90] sm:$0xff]  ;;  %v1065_v11 = vld [vmem:[%s2603_s8 + $0x98] sm:$0xff] }
 0x268   :  { %v562_v15 = vmul.f32 1.442695, %v558_v12  ;;  %v564_v16 = vmul.f32 1.442695, %v559_v13  ;;  %v566_v18 = vmul.f32 1.442695, %v560_v14  ;;  %v1720_v13 = vpack.c.bf16 %v1065_v11, %v1064_v10 }
 0x269   :  { %v568_v22 = vmul.f32 1.442695, %v561_v17  ;;  %v1048_v14 = vld [vmem:[%s2603_s8 + $0x10] sm:$0xff]  ;;  %v1067_v17 = vld [vmem:[%s2603_s8 + $0xa8] sm:$0xff] }
 0x26a   :  { %1823 = vpow2.f32 %v562_v15  ;;  %v1049_v15 = vld [vmem:[%s2603_s8 + $0x18] sm:$0xff]  ;;  %v1091_v10 = vld [vmem:[%s2603_s8 + $0x168] sm:$0xff] }
 0x26b   :  { %1825 = vpow2.f32 %v564_v16  ;;  %v814_v19 = vpop.xlane.xlu1 %813  ;;  %v1066_v16 = vld [vmem:[%s2603_s8 + $0xa0] sm:$0xff] }
 0x26c   :  { %v819_v21 = vrot.slane %v814_v19, %v2220_v30  ;;  %1827 = vpow2.f32 %v566_v18  ;;  %v823_v26 = vrot.slane %v814_v19, %v2226_v33  ;;  %v1722_v18 = vpack.c.bf16 %v1049_v15, %v1048_v14 }
 0x26d   :  { %1829 = vpow2.f32 %v568_v22  ;;  %v1724_v19 = vpack.c.bf16 %v1067_v17, %v1066_v16  ;;  %v1051_v22 = vld [vmem:[%s2603_s8 + $0x28] sm:$0xff] }
 0x26e   :  { %v826_v23 = vsub.f32 %v777_v55, %v819_v21  ;;  %v827_v31 = vsub.f32 %v781_v29, %v819_v21  ;;  %v828_v37 = vsub.f32 %v783_v60, %v823_v26  ;;  %v829_v42 = vsub.f32 %v786_v62, %v823_v26  ;;  %v1050_v21 = vld [vmem:[%s2603_s8 + $0x20] sm:$0xff]  ;;  %v1069_v26 = vld [vmem:[%s2603_s8 + $0xb8] sm:$0xff] }
 0x270   :  { %v830_v24 = vmul.f32 1.442695, %v826_v23  ;;  %v832_v40 = vmul.f32 1.442695, %v827_v31  ;;  %v834_v30 = vmul.f32 1.442695, %v828_v37 }
 0x271   :  { %v836_v44 = vmul.f32 1.442695, %v829_v42  ;;  %v1068_v23 = vld [vmem:[%s2603_s8 + $0xb0] sm:$0xff]  ;;  %v1078_v31 = vld [vmem:[%s2603_s8 + $0x100] sm:$0xff] }
 0x272   :  { %1831 = vpow2.f32 %v830_v24  ;;  %v1079_v24 = vld [vmem:[%s2603_s8 + $0x108] sm:$0xff]  ;;  %v1728_v37 = vpack.c.bf16 %v1069_v26, %v1068_v23  ;;  %v1070_v42 = vld [vmem:[%s2603_s8 + $0xc0] sm:$0xff] }
 0x273   :  { %1833 = vpow2.f32 %v832_v40  ;;  %v1052_v40 = vld [vmem:[%s2603_s8 + $0x30] sm:$0xff]  ;;  %v1242_v23 = vld [vmem:[%s2604_s9] sm:$0xff]  ;;  %v1243_v26 = vld [vmem:[%s2604_s9 + $0x8] sm:$0xff] }
 0x274   :  { %v1824_v25 = vpop.eup %1823  ;;  %1835 = vpow2.f32 %v834_v30  ;;  %v1071_v30 = vld [vmem:[%s2603_s8 + $0xc8] sm:$0xff] }
 0x275   :  { %v1826_v36 = vpop.eup %1825  ;;  %573 = vperm.xlu0 %1811, %v1824_v25   ;;  %1837 = vpow2.f32 %v836_v44  ;;  %v1726_v25 = vpack.c.bf16 %v1051_v22, %v1050_v21  ;;  %v1732_v44 = vpack.c.bf16 %v1071_v30, %v1070_v42  ;;  %v1244_v42 = vld [vmem:[%s2604_s9 + $0x10] sm:$0xff]  ;;  %v1245_v30 = vld [vmem:[%s2604_s9 + $0x18] sm:$0xff] }
 0x276   :  { %576 = vperm.xlu1 %1812, %v1826_v36   ;;  %v1828_v41 = vpop.eup %1827  ;;  %v1749_v36 = vpack.c.bf16 %v1079_v24, %v1078_v31 }
 0x277   :  { %v1830_v43 = vpop.eup %1829 }
 0x27a   :  { %666 = vperm.xlu1 %1812, %v1828_v41   ;;  %v1053_v41 = vld [vmem:[%s2603_s8 + $0x38] sm:$0xff] }
 0x27c   :  { %v1832_v45 = vpop.eup %1831 }
 0x27d   :  { %v1834_v33 = vpop.eup %1833 }
 0x27e   :  { %669 = vperm.xlu1 %1812, %v1830_v43   ;;  %v1836_v46 = vpop.eup %1835  ;;  %v1730_v43 = vpack.c.bf16 %v1053_v41, %v1052_v40  ;;  %v1773_v41 = vpack.c.bf16 %v1243_v26, %v1242_v23 }
 0x27f   :  { %v1838_v48 = vpop.eup %1837 }
 0x282   :  { %841 = vperm.xlu1 %1812, %v1832_v45   ;;  %v1054_v45 = vld [vmem:[%s2603_s8 + $0x40] sm:$0xff] }
 0x286   :  { %844 = vperm.xlu1 %1812, %v1834_v33   ;;  %v1055_v33 = vld [vmem:[%s2603_s8 + $0x48] sm:$0xff] }
 0x28a   :  { %934 = vperm.xlu1 %1812, %v1836_v46   ;;  %v1734_v46 = vpack.c.bf16 %v1055_v33, %v1054_v45  ;;  %v1246_v33 = vld [vmem:[%s2604_s9 + $0x20] sm:$0xff] }
 0x28e   :  { %937 = vperm.xlu1 %1812, %v1838_v48   ;;  %v1072_v48 = vld [vmem:[%s2603_s8 + $0xd0] sm:$0xff] }
 0x2f4   :  { %v574_v50 = vpop.permute.xlu0 %573 }
 0x2f5   :  { %v581_v51 = vrot.slane %v574_v50, %v2287_v49  ;;  %v577_v52 = vpop.permute.xlu1 %576  ;;  %v1073_v50 = vld [vmem:[%s2603_s8 + $0xd8] sm:$0xff] }
 0x2f6   :  { %v585_v54 = vrot.slane %v577_v52, %v2284_v47  ;;  %v1736_v52 = vpack.c.bf16 %v1073_v50, %v1072_v48 }
 0x2f8   :  { %v586_v28 = vsel %vm529_vm7, %v585_v54, %v581_v51  ;;  %v1056_v51 = vld [vmem:[%s2603_s8 + $0x50] sm:$0xff] }
 0x2f9   :  { %1544 = vmatmul.mubr.msk.f32.vlgmr.msra.gmra.mrb[6].mxu1 %vm587_vm11, %v586_v28  ;;  %v667_v55 = vpop.permute.xlu1 %666  ;;  %v1080_v54 = vld [vmem:[%s2603_s8 + $0x110] sm:$0xff] }
 0x2fa   :  { %1707 = vmatpush3.bf16.msk.msra.mxu1 %vm2209_vm5, %v1705_v53  ;;  %1550 = vmatprep.mubr.msk.f32.mxu1 %vm1912_vm2, %v1910_v7  ;;  %v674_v20 = vrot.slane %v667_v55, %v2287_v49  ;;  %v1057_v53 = vld [vmem:[%s2603_s8 + $0x58] sm:$0xff] }
 0x2fb   :  { %1708 = vmatprep.subr.bf16.mxu1 %v1911_v32  ;;  %v1738_v55 = vpack.c.bf16 %v1057_v53, %v1056_v51 }
 0x2fd   :  { %v670_v56 = vpop.permute.xlu1 %669 }
 0x2fe   :  { %v678_v6 = vrot.slane %v670_v56, %v2284_v47 }
 0x300   :  { %v679_v27 = vsel %vm529_vm7, %v678_v6, %v674_v20  ;;  %v1075_v20 = vld [vmem:[%s2603_s8 + $0xe8] sm:$0xff]  ;;  %v1058_v6 = vld [vmem:[%s2603_s8 + $0x60] sm:$0xff] }
 0x301   :  { %1551 = vmatmul.mubr.msk.f32.vlgmr.msra.gmra.mrb[8].mxu1 %vm587_vm11, %v679_v27  ;;  %v842_v58 = vpop.permute.xlu1 %841  ;;  %v755_v59 = vsel %vm540_vm8, %v679_v27, %v586_v28  ;;  %v1081_v28 = vld [vmem:[%s2603_s8 + $0x118] sm:$0xff]  ;;  %v1059_v27 = vld [vmem:[%s2603_s8 + $0x68] sm:$0xff] }
 0x302   :  { %v757_v60 = vsel %vm543_vm9, %v755_v59, 0.0  ;;  %1711 = vmatpush3.bf16.msk.msra.mxu1 %vm2325_vm12, %v1709_v57  ;;  %1557 = vmatprep.mubr.msk.f32.mxu1 %vm1912_vm2, %v1910_v7  ;;  %v849_v61 = vrot.slane %v842_v58, %v2287_v49  ;;  %v1752_v56 = vpack.c.bf16 %v1081_v28, %v1080_v54  ;;  %v1074_v57 = vld [vmem:[%s2603_s8 + $0xe0] sm:$0xff]  ;;  %v1083_v59 = vld [vmem:[%s2603_s8 + $0x128] sm:$0xff] }
 0x303   :  { %758 = vadd.xlane.f32.xlu1 %v757_v60  ;;  %1712 = vmatprep.subr.bf16.mxu1 %v1911_v32  ;;  %v1740_v29 = vpack.c.bf16 %v1075_v20, %v1074_v57  ;;  %v1082_v58 = vld [vmem:[%s2603_s8 + $0x120] sm:$0xff]  ;;  %v1742_v60 = vpack.c.bf16 %v1059_v27, %v1058_v6  ;;  %v1248_v57 = vld [vmem:[%s2604_s9 + $0x30] sm:$0xff]  ;;  %v1249_v20 = vld [vmem:[%s2604_s9 + $0x38] sm:$0xff] }
 0x304   :  { %v1782_v6 = vpack.c.bf16 %v1249_v20, %v1248_v57  ;;  %v1251_v27 = vld [vmem:[%s2604_s9 + $0x48] sm:$0xff] }
 0x305   :  { %v845_v34 = vpop.permute.xlu1 %844 }
 0x306   :  { %v853_v62 = vrot.slane %v845_v34, %v2284_v47  ;;  %v1755_v34 = vpack.c.bf16 %v1083_v59, %v1082_v58  ;;  %v1252_v59 = vld [vmem:[%s2604_s9 + $0x50] sm:$0xff] }
 0x308   :  { %v854_v63 = vsel %vm529_vm7, %v853_v62, %v849_v61  ;;  %v1077_v61 = vld [vmem:[%s2603_s8 + $0xf8] sm:$0xff] }
 0x309   :  { %1558 = vmatmul.mubr.msk.f32.vlgmr.msra.gmra.mrb[10].mxu1 %vm855_vm13, %v854_v63  ;;  %v935_v0 = vpop.permute.xlu1 %934 }
 0x30a   :  { %1715 = vmatpush3.bf16.msk.msra.mxu1 %vm2325_vm12, %v1713_v35  ;;  %1564 = vmatprep.mubr.msk.f32.mxu1 %vm1912_vm2, %v1910_v7  ;;  %v942_v38 = vrot.slane %v935_v0, %v2287_v49  ;;  %v1063_v49 = vld [vmem:[%s2603_s8 + $0x88] sm:$0xff]  ;;  %v1076_v35 = vld [vmem:[%s2603_s8 + $0xf0] sm:$0xff]  ;;  %v1061_v0 = vld [vmem:[%s2603_s8 + $0x78] sm:$0xff] }
 0x30b   :  { %1748 = vmatprep.subr.bf16.mxu1 %v1911_v32  ;;  %v1716_v8 = vpack.c.bf16 %v1063_v49, %v1062_v5  ;;  %v1744_v62 = vpack.c.bf16 %v1077_v61, %v1076_v35  ;;  %v1088_v49 = vld [vmem:[%s2603_s8 + $0x150] sm:$0xff]  ;;  %v1254_v35 = vld [vmem:[%s2604_s9 + $0x60] sm:$0xff]  ;;  %v1255_v61 = vld [vmem:[%s2604_s9 + $0x68] sm:$0xff] }
 0x30d   :  { %v938_v1 = vpop.permute.xlu1 %937  ;;  %1717 = vmatprep.subr.bf16.mxu0 %v1716_v8 }
 0x30e   :  { %v946_v39 = vrot.slane %v938_v1, %v2284_v47  ;;  %v1046_v47 = vld [vmem:[%s2603_s8] sm:$0xff]  ;;  %v1084_v1 = vld [vmem:[%s2603_s8 + $0x130] sm:$0xff] }
 0x30f   :  { %v1718_v12 = vpack.c.bf16 %v1047_v9, %v1046_v47  ;;  %v1089_v47 = vld [vmem:[%s2603_s8 + $0x158] sm:$0xff]  ;;  %v1090_v9 = vld [vmem:[%s2603_s8 + $0x160] sm:$0xff] }
 0x310   :  { %v947_v2 = vsel %vm529_vm7, %v946_v39, %v942_v38  ;;  %v1085_v39 = vld [vmem:[%s2603_s8 + $0x138] sm:$0xff]  ;;  %v1764_v8 = vpack.c.bf16 %v1089_v47, %v1088_v49  ;;  %v1767_v11 = vpack.c.bf16 %v1091_v10, %v1090_v9 }
 0x311   :  { %1565 = vmatmul.mubr.msk.f32.vlgmr.msra.gmra.mrb[12].mxu1 %vm855_vm13, %v947_v2  ;;  %v1023_v3 = vsel %vm540_vm8, %v947_v2, %v854_v63  ;;  %1719 = vmatpush3.bf16.msra.mxu0 %v1718_v12  ;;  %v1060_v63 = vld [vmem:[%s2603_s8 + $0x70] sm:$0xff]  ;;  %v1758_v2 = vpack.c.bf16 %v1085_v39, %v1084_v1 }
 0x312   :  { %v1025_v4 = vsel %vm811_vm10, %v1023_v3, 0.0  ;;  %1599 = vmatprep.mubr.msk.f32.mxu1 %vm1912_vm2, %v1910_v7  ;;  %1721 = vmatprep.subr.bf16.mxu0 %v1720_v13  ;;  %v1746_v38 = vpack.c.bf16 %v1061_v0, %v1060_v63  ;;  %v1086_v3 = vld [vmem:[%s2603_s8 + $0x140] sm:$0xff]  ;;  %v1092_v12 = vld [vmem:[%s2603_s8 + $0x170] sm:$0xff]  ;;  %v1093_v13 = vld [vmem:[%s2603_s8 + $0x178] sm:$0xff] }
 0x313   :  { %1026 = vadd.xlane.f32.xlu0 %v1025_v4  ;;  %1750 = vmatpush3.bf16.msra.mxu1 %v1749_v36  ;;  %v1087_v4 = vld [vmem:[%s2603_s8 + $0x148] sm:$0xff]  ;;  %v1770_v14 = vpack.c.bf16 %v1093_v13, %v1092_v12  ;;  %v1256_v63 = vld [vmem:[%s2604_s9 + $0x70] sm:$0xff]  ;;  %v1257_v0 = vld [vmem:[%s2604_s9 + $0x78] sm:$0xff] }
 0x314   :  { %1751 = vmatprep.subr.bf16.mxu1 %v1911_v32  ;;  %v1761_v5 = vpack.c.bf16 %v1087_v4, %v1086_v3  ;;  %v1794_v1 = vpack.c.bf16 %v1257_v0, %v1256_v63  ;;  %v1390_v3 = vld [vmem:[%s2605_s10] ss:$0 sm:$0xff] }
 0x315   :  { %1723 = vmatpush3.bf16.msra.mxu0 %v1722_v18 }
 0x316   :  { %1725 = vmatprep.subr.bf16.mxu0 %v1724_v19 }
 0x317   :  { %1753 = vmatpush3.bf16.msra.mxu1 %v1752_v56 }
 0x318   :  { %1754 = vmatprep.subr.bf16.mxu1 %v1911_v32 }
 0x319   :  { %1727 = vmatpush3.bf16.msra.mxu0 %v1726_v25 }
 0x31a   :  { %1729 = vmatprep.subr.bf16.mxu0 %v1728_v37 }
 0x31b   :  { %1756 = vmatpush3.bf16.msra.mxu1 %v1755_v34 }
 0x31c   :  { %1757 = vmatprep.subr.bf16.mxu1 %v1911_v32 }
 0x31d   :  { %1731 = vmatpush3.bf16.msra.mxu0 %v1730_v43 }
 0x31e   :  { %1733 = vmatprep.subr.bf16.mxu0 %v1732_v44  ;;  %v1776_v44 = vpack.c.bf16 %v1245_v30, %v1244_v42 }
 0x31f   :  { %1759 = vmatpush3.bf16.msra.mxu1 %v1758_v2 }
 0x320   :  { %1760 = vmatprep.subr.bf16.mxu1 %v1911_v32 }
 0x321   :  { %1735 = vmatpush3.bf16.msra.mxu0 %v1734_v46  ;;  %v1247_v46 = vld [vmem:[%s2604_s9 + $0x28] sm:$0xff] }
 0x322   :  { %1737 = vmatprep.subr.bf16.mxu0 %v1736_v52  ;;  %v1779_v50 = vpack.c.bf16 %v1247_v46, %v1246_v33 }
 0x323   :  { %1762 = vmatpush3.bf16.msra.mxu1 %v1761_v5 }
 0x324   :  { %1763 = vmatprep.subr.bf16.mxu1 %v1911_v32 }
 0x325   :  { %1739 = vmatpush3.bf16.msra.mxu0 %v1738_v55 }
 0x326   :  { %1741 = vmatprep.subr.bf16.mxu0 %v1740_v29  ;;  %v1250_v29 = vld [vmem:[%s2604_s9 + $0x40] sm:$0xff] }
 0x327   :  { %1765 = vmatpush3.bf16.msra.mxu1 %v1764_v8  ;;  %v1785_v58 = vpack.c.bf16 %v1251_v27, %v1250_v29 }
 0x328   :  { %1766 = vmatprep.subr.bf16.mxu1 %v1911_v32 }
 0x329   :  { %1743 = vmatpush3.bf16.msra.mxu0 %v1742_v60  ;;  %v1253_v60 = vld [vmem:[%s2604_s9 + $0x58] sm:$0xff] }
 0x32a   :  { %1745 = vmatprep.subr.bf16.mxu0 %v1744_v62  ;;  %v1788_v34 = vpack.c.bf16 %v1253_v60, %v1252_v59  ;;  %v1791_v62 = vpack.c.bf16 %v1255_v61, %v1254_v35 }
 0x32b   :  { %1768 = vmatpush3.bf16.msra.mxu1 %v1767_v11 }
 0x32c   :  { %1769 = vmatprep.subr.bf16.mxu1 %v1911_v32 }
 0x32d   :  { %1747 = vmatpush3.bf16.msra.mxu0 %v1746_v38 }
 0x32e   :  { %1772 = vmatprep.subr.bf16.mxu0 %v1911_v32 }
 0x32f   :  { %1771 = vmatpush3.bf16.msra.mxu1 %v1770_v14 }
 0x390   :  { %v759_v15 = vpop.xlane.xlu1 %758 }
 0x391   :  { %v761_v16 = vrot.slane %v759_v15, 1 }
 0x393   :  { %1839 = vrcp.f32 %v761_v16 }
 0x394   :  { %1841 = vrcp.f32 %v759_v15 }
 0x39d   :  { %v1840_v21 = vpop.eup %1839 }
 0x39e   :  { %v1842_v25 = vpop.eup %1841 }
 0x3a0   :  { %v1027_v19 = vpop.xlane.xlu0 %1026 }
 0x3a1   :  { %v1029_v36 = vrot.slane %v1027_v19, 1 }
 0x3a3   :  { %1843 = vrcp.f32 %v1029_v36 }
 0x3a4   :  { %1845 = vrcp.f32 %v1027_v19 }
 0x3ad   :  { %v1844_v51 = vpop.eup %1843 }
 0x3ae   :  { %v1846_v54 = vpop.eup %1845 }
 0x3cc   :  { %v659_v17 = vpop.f32.mrb[6].mxu1 }
 0x3cd   :  { %v1545_v18 = vpop.f32.mrb[7].mxu1  ;;  %v765_v37 = vmul.f32 %v1842_v25, %v659_v17 }
 0x3d4   :  { %v751_v22 = vpop.f32.mrb[8].mxu1 }
 0x3d5   :  { %v767_v31 = vmul.f32 %v1840_v21, %v751_v22  ;;  %v1552_v24 = vpop.f32.mrb[9].mxu1 }
 0x3d7   :  { %v1038_v40 = vrot.slane %v767_v31, 7 }
 0x3d9   :  { %v1039_v43 = vsel %vm540_vm8, %v1038_v40, %v765_v37 }
 0x3da   :  { %1166 = vmatmul.mubr.f32.vlgmr.msra.gmra.mrb[2].mxu0 %v1039_v43 }
 0x3db   :  { %1774 = vmatpush3.bf16.msra.mxu0 %v1773_v41  ;;  %1634 = vmatprep.mubr.msk.f32.mxu0 %vm1912_vm2, %v1910_v7 }
 0x3dc   :  { %v927_v45 = vpop.f32.mrb[10].mxu1  ;;  %1775 = vmatprep.subr.bf16.mxu0 %v1911_v32 }
 0x3dd   :  { %v1559_v48 = vpop.f32.mrb[11].mxu1  ;;  %v1033_v28 = vmul.f32 %v1846_v54, %v927_v45 }
 0x3df   :  { %1777 = vmatpush3.bf16.msra.mxu0 %v1776_v44 }
 0x3e0   :  { %1778 = vmatprep.subr.bf16.mxu0 %v1911_v32 }
 0x3e3   :  { %1780 = vmatpush3.bf16.msra.mxu0 %v1779_v50 }
 0x3e4   :  { %v1019_v7 = vpop.f32.mrb[12].mxu1  ;;  %1781 = vmatprep.subr.bf16.mxu0 %v1911_v32 }
 0x3e5   :  { %v1035_v52 = vmul.f32 %v1844_v51, %v1019_v7  ;;  %v1566_v53 = vpop.f32.mrb[13].mxu1 }
 0x3e7   :  { %v1043_v55 = vrot.slane %v1035_v52, 7  ;;  %1783 = vmatpush3.bf16.msra.mxu0 %v1782_v6 }
 0x3e8   :  { %1784 = vmatprep.subr.bf16.mxu0 %v1911_v32 }
 0x3e9   :  { %v1044_v56 = vsel %vm540_vm8, %v1043_v55, %v1033_v28 }
 0x3ea   :  { %1600 = vmatmul.mubr.f32.vlgmr.msra.gmra.mrb[14].mxu1 %v1044_v56 }
 0x3eb   :  { %1786 = vmatpush3.bf16.msra.mxu0 %v1785_v58 }
 0x3ec   :  { %1787 = vmatprep.subr.bf16.mxu0 %v1911_v32 }
 0x3ef   :  { %1789 = vmatpush3.bf16.msra.mxu0 %v1788_v34 }
 0x3f0   :  { %1790 = vmatprep.subr.bf16.mxu0 %v1911_v32 }
 0x3f3   :  { %1792 = vmatpush3.bf16.msra.mxu0 %v1791_v62 }
 0x3f4   :  { %1793 = vmatprep.subr.bf16.mxu0 %v1911_v32 }
 0x3f7   :  { %1795 = vmatpush3.bf16.msra.mxu0 %v1794_v1 }
 0x4ad   :  { %v1460_v38 = vpop.f32.mrb[2].mxu0 }
 0x4ae   :  { %v1461_v39 = vpop.f32.mrb[3].mxu0 }
 0x4af   :  { %v1462_v2 = vadd.f32 %v1461_v39, %v1460_v38 }
 0x4b1   :  { %v1168_v4 = vadd.f32 %v1462_v2, %v1390_v3 }
 0x4bd   :  { %v1237_v5 = vpop.f32.mrb[14].mxu1 }
 0x4be   :  { %v1238_v32 = vadd.f32 %v1237_v5, %v1168_v4  ;;  %v1601_v49 = vpop.f32.mrb[15].mxu1 }
 0x4c0   :  { %v1241_v47 = vmax.f32 %v1238_v32, 0.0 }
 0x4c2   :  { %1635 = vmatmul.mubr.f32.vlgmr.msra.gmra.mrb[4].mxu0 %v1241_v47 }
 0x4c3   :  { %1870 = shalt.err (!%p1867_p13)
}
 0x4c4   :  { %s1871_s25 = scalar_lea.hbm %s2607_s12, 32 }
 0x4c5   :  { %p1872_p0 = scmp.ne.s32.totalorder %s2607_s12, %s1871_s25  ;;  %p1875_p1 = scmp.lt.u32.totalorder %s1871_s25, %s2607_s12 }
 0x4c7   :  { %p1877_p2 = pnand %p1875_p1, %p1872_p0 }
 0x4c9   :  { %1880 = shalt.err (!%p1877_p2)
}
 0x4ca   :  { %1355 = dma.vmem_to_hbm [thread:$0]  %s1353_s23, 32, %s2607_s12, [#allocation8]   ;;  %v1391_v8 = vld [vmem:[%s2605_s10 + $0x1] ss:$0 sm:$0xff] }
 0x4cb   :  { %s1917_s30 = smov [#allocation5]  }
 0x4cc   :  { %s1342_s14 = sshll.u32 %s1917_s30, 4  ;;  %s1343_s14 = int_to_ptr.vmem [resolvable:$true] %s1342_s14 }
 0x4cd   :  { %s1881_s1 = scalar_lea.vmem %s1343_s14, 32  ;;  %p1886_p4 = scmp.lt.s32.totalorder %s1343_s14, %s1343_s14 }
 0x4ce   :  { %p1882_p3 = scmp.ne.s32.totalorder %s1343_s14, %s1881_s1  ;;  %p1887_p5 = scmp.lt.s32.totalorder %s1881_s1, %s1881_s1 }
 0x4d0   :  { %p1888_p6 = por %p1887_p5, %p1886_p4 }
 0x4d2   :  { %p1889_p7 = pnand %p1888_p6, %p1882_p3 }
 0x595   :  { %v1331_v9 = vpop.f32.mrb[4].mxu0 }
 0x596   :  { %v1332_v10 = vadd.f32 %v1391_v8, %v1331_v9  ;;  %v1636_v11 = vpop.f32.mrb[5].mxu0 }
 0x598   :  { %1335 = vst [vmem:[#allocation5] sm:$0x3] %v1332_v10 }
 0x599   :  { %1892 = shalt.err (!%p1889_p7)
}
 0x59a   :  { %s1893_s13 = scalar_lea.hbm %s2606_s11, 32 }
 0x59b   :  { %p1894_p8 = scmp.ne.s32.totalorder %s2606_s11, %s1893_s13  ;;  %p1897_p9 = scmp.lt.u32.totalorder %s1893_s13, %s2606_s11 }
 0x59d   :  { %p1899_p10 = pnand %p1897_p9, %p1894_p8 }
 0x59f   :  { %1902 = shalt.err (!%p1899_p10)
}
 0x5a0   :  { %1345 = dma.vmem_to_hbm [thread:$0]  %s1343_s14, 32, %s2606_s11, [#allocation6]  }
 0x5a1   :  { %1905 = dma.done.wait [#allocation6], 32  }
 0x5a2   :  { %1906 = vsyncadd [#allocation6], 4294967264 }
 0x5a3   :  { %1907 = dma.done.wait [#allocation8], 32  }
 0x5a4   :  { %1908 = vsyncadd [#allocation8], 4294967264 }
 0x5a5   :  { %1362 = vsyncpa [#allocation6], 1 }
 0x5a6   :  { %1363 = vsyncpa [#allocation8], 1 }

</bundles_post_ra>
